<compile_context>
chip_gen: v7x
topology: tpu7x:2x2x1
jax: 0.10.0
libtpu: 0.0.40
codegen_flags: <defaults>
</compile_context>

<pallas_src>
import jax
import jax.numpy as jnp
from jax.experimental import pallas as pl
from jax.experimental.pallas import tpu as pltpu


def gaze_mlp_kernel(x_ref, w1_ref, b1_ref, w2_ref, b2_ref, w3_ref, b3_ref, o_ref):
    # x tile: (6, TILE_B) bf16, batch on the lane (fast) axis.
    x = x_ref[...]                                                         # (6, TB) bf16

    # Linear(6, 64) + ReLU. bf16 x bf16 operands -> f32 accumulate on the MXU.
    h1 = jnp.dot(w1_ref[...], x, preferred_element_type=jnp.float32)       # (64, TB) f32
    h1 = jnp.maximum(h1 + b1_ref[...], 0.0)

    # Dropout(0.3): identity in inference mode.
    # TODO(synk): training-mode dropout (pltpu.prng_random_bits mask) not emitted here.

    # Linear(64, 32) + ReLU. Recast the activation to bf16 so the second matmul also
    # gets bf16 operands (halves the (64, TB) intermediate's vreg/VMEM traffic).
    h2 = jnp.dot(w2_ref[...], h1.astype(jnp.bfloat16),
                 preferred_element_type=jnp.float32)                       # (32, TB) f32
    h2 = jnp.maximum(h2 + b2_ref[...], 0.0)

    # Linear(32, 1): VPU multiply + cross-sublane (XLU) reduce; an N=1 MXU matmul
    # would waste 255/256 of the MXU result path.
    out = jnp.sum(h2 * w3_ref[...], axis=0, keepdims=True) + b3_ref[...]   # (1, TB) f32
    o_ref[...] = out.astype(o_ref.dtype)


def gaze_classifier_forward(x, params, *, tile_b=8192):
    """x: (B, 6) float32. Returns (B,) float32 (the module's squeeze(-1))."""
    w1, b1, w2, b2, w3, b3 = params
    B = x.shape[0]

    # Lane-aligned tile; clamp so tiny batches don't over-pad (single tile).
    tile_b = max(128, pl.cdiv(tile_b, 128) * 128)
    tile_b = min(tile_b, pl.cdiv(B, 128) * 128)
    # v7x megacore: keep num_tiles >= 2 so both TensorCores get work via the
    # "parallel" grid axis, but never shrink a tile below 1024 rows (per-grid-step
    # overhead would start to dominate on the single-TC generations).
    half_tile = pl.cdiv(pl.cdiv(B, 2), 128) * 128
    if half_tile >= 1024:
        tile_b = min(tile_b, half_tile)

    num_tiles = pl.cdiv(B, tile_b)
    b_pad = num_tiles * tile_b

    # Feature-major bf16 stream: cast *before* transposing (half the copy bytes),
    # zero-pad the batch up to the tile multiple (padded lanes are sliced off the
    # output, so the trailing tile never leaks garbage).
    # TODO(synk): a producer that emits (6, B) bf16 directly would remove this
    # extra HBM pass over x entirely.
    xt = jnp.pad(x.astype(jnp.bfloat16).T, ((0, 0), (0, b_pad - B)))

    const2d = lambda arr: pl.BlockSpec(arr.shape, lambda i: (0, 0))  # VMEM-resident

    out = pl.pallas_call(
        gaze_mlp_kernel,
        out_shape=jax.ShapeDtypeStruct((1, b_pad), jnp.float32),
        grid=(num_tiles,),
        in_specs=[
            pl.BlockSpec((6, tile_b), lambda i: (0, i)),   # x: streamed, double-buffered
            const2d(w1), const2d(b1),
            const2d(w2), const2d(b2),
            const2d(w3), const2d(b3),
        ],
        out_specs=pl.BlockSpec((1, tile_b), lambda i: (0, i)),  # lane-dense, unmasked vst
        compiler_params=pltpu.CompilerParams(
            dimension_semantics=("parallel",),  # shard the batch across v7x's 2 TCs
        ),
    )(xt, w1, b1, w2, b2, w3, b3)

    return out[0, :B]  # drop padding; this is the module's squeeze(-1)


def init_params(key):
    """PyTorch nn.Linear default init (U(-1/sqrt(fan_in), +1/sqrt(fan_in))).
    Matmul weights stored feature-major (out, in) as bf16 (MXU operands); biases
    stored (out, 1) f32; the final 32->1 weight stored (32, 1) f32 for the VPU reduce."""
    def linear(key, fan_in, fan_out):
        kw, kb = jax.random.split(key)
        bound = 1.0 / jnp.sqrt(fan_in)
        w = jax.random.uniform(kw, (fan_out, fan_in), jnp.float32, -bound, bound)
        b = jax.random.uniform(kb, (fan_out, 1), jnp.float32, -bound, bound)
        return w, b

    k1, k2, k3 = jax.random.split(key, 3)
    w1, b1 = linear(k1, 6, 64)
    w2, b2 = linear(k2, 64, 32)
    w3, b3 = linear(k3, 32, 1)
    return (w1.astype(jnp.bfloat16), b1,
            w2.astype(jnp.bfloat16), b2,
            w3.T, b3)


if __name__ == "__main__":
    key = jax.random.PRNGKey(0)
    k_param, k_x = jax.random.split(key)

    params = init_params(k_param)
    w1, b1, w2, b2, w3, b3 = params

    def reference(x):
        # Plain-JAX reference of the same bf16-operand pipeline
        # (inference-mode dropout = identity).
        xq = x.astype(jnp.bfloat16).astype(jnp.float32)
        h1 = jnp.maximum(xq @ w1.astype(jnp.float32).T + b1[:, 0], 0.0)
        h1 = h1.astype(jnp.bfloat16).astype(jnp.float32)
        h2 = jnp.maximum(h1 @ w2.astype(jnp.float32).T + b2[:, 0], 0.0)
        return h2 @ w3[:, 0] + b3[0, 0]

    # Small batch: single tile.
    x_small = jax.random.normal(k_x, (8, 6), dtype=jnp.float32)
    y_small = jax.block_until_ready(gaze_classifier_forward(x_small, params))
    assert y_small.shape == (8,)
    assert jnp.allclose(y_small, reference(x_small), atol=1e-2, rtol=1e-2), "mismatch (small)"

    # Ragged batch forced across multiple grid steps: exercises the pipelined
    # multi-tile path and the trailing-tile zero padding at a small size.
    x_multi = jax.random.normal(jax.random.PRNGKey(1), (300, 6), dtype=jnp.float32)
    y_multi = jax.block_until_ready(
        gaze_classifier_forward(x_multi, params, tile_b=128))
    assert y_multi.shape == (300,)
    assert jnp.allclose(y_multi, reference(x_multi), atol=1e-2, rtol=1e-2), "mismatch (multi)"

    print("KERNEL_OK")
</pallas_src>

<mosaic_0001>
module attributes {stable_mosaic.version = 11 : i64} {
  func.func @gaze_mlp_kernel(%arg0: i32, %arg1: memref<6x128xbf16, #tpu.memory_space<vmem>>, %arg2: memref<64x6xbf16, #tpu.memory_space<vmem>>, %arg3: memref<64x1xf32, #tpu.memory_space<vmem>>, %arg4: memref<32x64xbf16, #tpu.memory_space<vmem>>, %arg5: memref<32x1xf32, #tpu.memory_space<vmem>>, %arg6: memref<32x1xf32, #tpu.memory_space<vmem>>, %arg7: memref<1x1xf32, #tpu.memory_space<vmem>>, %arg8: memref<1x128xf32, #tpu.memory_space<vmem>>) attributes {dimension_semantics = [#tpu.dimension_semantics<parallel>], iteration_bounds = array<i64: 1>, scalar_prefetch = 0 : i64, scratch_operands = 0 : i64, tpu.core_type = #tpu.core_type<tc>, window_params = [{transform_indices = @transform_0, window_bounds = array<i64: 6, 128>}, {pipeline_mode = #tpu.pipeline_mode<synchronous>, transform_indices = @transform_1, window_bounds = array<i64: 64, 6>}, {pipeline_mode = #tpu.pipeline_mode<synchronous>, transform_indices = @transform_2, window_bounds = array<i64: 64, 1>}, {pipeline_mode = #tpu.pipeline_mode<synchronous>, transform_indices = @transform_3, window_bounds = array<i64: 32, 64>}, {pipeline_mode = #tpu.pipeline_mode<synchronous>, transform_indices = @transform_4, window_bounds = array<i64: 32, 1>}, {pipeline_mode = #tpu.pipeline_mode<synchronous>, transform_indices = @transform_5, window_bounds = array<i64: 32, 1>}, {pipeline_mode = #tpu.pipeline_mode<synchronous>, transform_indices = @transform_6, window_bounds = array<i64: 1, 1>}, {transform_indices = @transform_7, window_bounds = array<i64: 1, 128>}]} {
    %c0 = arith.constant 0 : index
    %c0_0 = arith.constant 0 : index
    %0 = vector.load %arg1[%c0, %c0_0] : memref<6x128xbf16, #tpu.memory_space<vmem>>, vector<6x128xbf16>
    %c0_1 = arith.constant 0 : index
    %c0_2 = arith.constant 0 : index
    %1 = vector.load %arg2[%c0_1, %c0_2] : memref<64x6xbf16, #tpu.memory_space<vmem>>, vector<64x6xbf16>
    %cst = arith.constant dense<0.000000e+00> : vector<64x128xf32>
    %2 = tpu.matmul %1, %0, %cst {dimension_numbers = #tpu.dot_dimension_numbers<[1], [0], [0], [1], [0, 0, 1, 1], [], []>} : vector<64x6xbf16>, vector<6x128xbf16>, vector<64x128xf32> -> vector<64x128xf32>
    %c0_3 = arith.constant 0 : index
    %c0_4 = arith.constant 0 : index
    %3 = vector.load %arg3[%c0_3, %c0_4] : memref<64x1xf32, #tpu.memory_space<vmem>>, vector<64x1xf32>
    %4 = vector.broadcast %3 : vector<64x1xf32> to vector<64x128xf32>
    %5 = arith.addf %2, %4 : vector<64x128xf32>
    %cst_5 = arith.constant 0.000000e+00 : f32
    %6 = vector.broadcast %cst_5 : f32 to vector<64x128xf32>
    %7 = arith.maximumf %5, %6 : vector<64x128xf32>
    %c0_6 = arith.constant 0 : index
    %c0_7 = arith.constant 0 : index
    %8 = vector.load %arg4[%c0_6, %c0_7] : memref<32x64xbf16, #tpu.memory_space<vmem>>, vector<32x64xbf16>
    %9 = arith.truncf %7 : vector<64x128xf32> to vector<64x128xbf16>
    %cst_8 = arith.constant dense<0.000000e+00> : vector<32x128xf32>
    %10 = tpu.matmul %8, %9, %cst_8 {dimension_numbers = #tpu.dot_dimension_numbers<[1], [0], [0], [1], [0, 0, 1, 1], [], []>} : vector<32x64xbf16>, vector<64x128xbf16>, vector<32x128xf32> -> vector<32x128xf32>
    %c0_9 = arith.constant 0 : index
    %c0_10 = arith.constant 0 : index
    %11 = vector.load %arg5[%c0_9, %c0_10] : memref<32x1xf32, #tpu.memory_space<vmem>>, vector<32x1xf32>
    %12 = vector.broadcast %11 : vector<32x1xf32> to vector<32x128xf32>
    %13 = arith.addf %10, %12 : vector<32x128xf32>
    %cst_11 = arith.constant 0.000000e+00 : f32
    %14 = vector.broadcast %cst_11 : f32 to vector<32x128xf32>
    %15 = arith.maximumf %13, %14 : vector<32x128xf32>
    %c0_12 = arith.constant 0 : index
    %c0_13 = arith.constant 0 : index
    %16 = vector.load %arg6[%c0_12, %c0_13] : memref<32x1xf32, #tpu.memory_space<vmem>>, vector<32x1xf32>
    %17 = vector.broadcast %16 : vector<32x1xf32> to vector<32x128xf32>
    %18 = arith.mulf %15, %17 : vector<32x128xf32>
    %cst_14 = arith.constant dense<0.000000e+00> : vector<128xf32>
    %19 = vector.multi_reduction <add>, %18, %cst_14 [0] : vector<32x128xf32> to vector<128xf32>
    %20 = vector.shape_cast %19 : vector<128xf32> to vector<1x128xf32>
    %c0_15 = arith.constant 0 : index
    %c0_16 = arith.constant 0 : index
    %21 = vector.load %arg7[%c0_15, %c0_16] : memref<1x1xf32, #tpu.memory_space<vmem>>, vector<1x1xf32>
    %22 = vector.broadcast %21 : vector<1x1xf32> to vector<1x128xf32>
    %23 = arith.addf %20, %22 : vector<1x128xf32>
    %c0_17 = arith.constant 0 : index
    %c0_18 = arith.constant 0 : index
    %24 = vector.load %arg8[%c0_17, %c0_18] : memref<1x128xf32, #tpu.memory_space<vmem>>, vector<1x128xf32>
    tpu.vector_store %arg8[%c0_17, %c0_18], %23 {strides = array<i32>} : memref<1x128xf32, #tpu.memory_space<vmem>>, vector<1x128xf32>,
    return
  }
  func.func @transform_0(%arg0: i32) -> (i32, i32) {
    %c0_i32 = arith.constant 0 : i32
    %c0_i32_0 = arith.constant 0 : i32
    return %c0_i32, %arg0 : i32, i32
  }
  func.func @transform_1(%arg0: i32) -> (i32, i32) {
    %c0_i32 = arith.constant 0 : i32
    %c0_i32_0 = arith.constant 0 : i32
    %c0_i32_1 = arith.constant 0 : i32
    return %c0_i32, %c0_i32_0 : i32, i32
  }
  func.func @transform_2(%arg0: i32) -> (i32, i32) {
    %c0_i32 = arith.constant 0 : i32
    %c0_i32_0 = arith.constant 0 : i32
    %c0_i32_1 = arith.constant 0 : i32
    return %c0_i32, %c0_i32_0 : i32, i32
  }
  func.func @transform_3(%arg0: i32) -> (i32, i32) {
    %c0_i32 = arith.constant 0 : i32
    %c0_i32_0 = arith.constant 0 : i32
    %c0_i32_1 = arith.constant 0 : i32
    return %c0_i32, %c0_i32_0 : i32, i32
  }
  func.func @transform_4(%arg0: i32) -> (i32, i32) {
    %c0_i32 = arith.constant 0 : i32
    %c0_i32_0 = arith.constant 0 : i32
    %c0_i32_1 = arith.constant 0 : i32
    return %c0_i32, %c0_i32_0 : i32, i32
  }
  func.func @transform_5(%arg0: i32) -> (i32, i32) {
    %c0_i32 = arith.constant 0 : i32
    %c0_i32_0 = arith.constant 0 : i32
    %c0_i32_1 = arith.constant 0 : i32
    return %c0_i32, %c0_i32_0 : i32, i32
  }
  func.func @transform_6(%arg0: i32) -> (i32, i32) {
    %c0_i32 = arith.constant 0 : i32
    %c0_i32_0 = arith.constant 0 : i32
    %c0_i32_1 = arith.constant 0 : i32
    return %c0_i32, %c0_i32_0 : i32, i32
  }
  func.func @transform_7(%arg0: i32) -> (i32, i32) {
    %c0_i32 = arith.constant 0 : i32
    %c0_i32_0 = arith.constant 0 : i32
    return %c0_i32, %arg0 : i32, i32
  }
}

</mosaic_0001>

<bundles_post_ra>
// kernel: tpu_custom_call.1
= control target key start
LH: loop header
LB: loop body
LE: loop exit
PB: predicated region body
PF: predicated region fallthrough
CT: control target
= control target key end

     0   :  { %s574_s0 = inlined_call_operand.vmem [shape: bf16[6,128], index: 0, kind: input, shape index: {}]   ;;  %s575_s1 = inlined_call_operand.vmem [shape: bf16[64,6], index: 1, kind: input, shape index: {}]   ;;  %s576_s2 = inlined_call_operand.vmem [shape: f32[64,1], index: 2, kind: input, shape index: {}]   ;;  %s577_s3 = inlined_call_operand.vmem [shape: bf16[32,64], index: 3, kind: input, shape index: {}]   ;;  %s578_s4 = inlined_call_operand.vmem [shape: f32[32,1], index: 4, kind: input, shape index: {}]   ;;  %s579_s5 = inlined_call_operand.vmem [shape: f32[32,1], index: 5, kind: input, shape index: {}]   ;;  %s580_s6 = inlined_call_operand.<no memory space> [shape: f32[1,1], index: 6, kind: input, shape index: {}]   ;;  %s581_s7 = inlined_call_operand.hbm [shape: f32[1,128], index: 7, kind: output, shape index: {}]  }
   0x1   :  { %v12_v0 = vstv %s580_s6 }
   0x2   :  { %13 = vst [vmem:[#allocation2] sm:$0x1] %v12_v0 }
   0x3   :  { %v30_v1 = vld [vmem:[%s574_s0] sm:$0x7]  ;;  %vm120_vm0 = vcmask 1042432   ;;  %vm107_vm1 = vcmask 48128   ;;  %v413_v4 = vld [vmem:[%s575_s1 + $0x8] sm:$0xff]   ;;  %v414_v5 = vld [vmem:[%s575_s1 + $0x10] sm:$0xff]  }
   0x4   :  { %v412_v2 = vld [vmem:[%s575_s1] sm:$0xff]   ;;  %407 = vmatprep.subr.msk.bf16.mxu0 %vm120_vm0, %v30_v1  ;;  %v122_v3 = vsel %vm120_vm0, %v30_v1, 0  ;;  %v442_v6 = vmov 0   ;;  %v41_v8 = vld [vmem:[%s576_s2 + $0x10] sm:$0xff]  ;;  %v40_v9 = vld [vmem:[%s576_s2 + $0x8] sm:$0xff] }
   0x5   :  { %386 = vmatpush3.bf16.msra.mxu0 %v122_v3  ;;  %387 = vmatprep.mubr.msk.bf16.mxu0 %vm107_vm1, %v412_v2  ;;  %v39_v7 = vld [vmem:[%s576_s2] sm:$0xff]  ;;  %v42_v10 = vld [vmem:[%s576_s2 + $0x18] sm:$0xff]  ;;  %v44_v13 = vld [vmem:[%s576_s2 + $0x28] sm:$0xff] }
   0x6   :  { %410 = vset.pattern.permute.xlu0 %v442_v6  ;;  %411 = vset.pattern.permute.xlu1 %v442_v6  ;;  %v415_v11 = vld [vmem:[%s575_s1 + $0x18] sm:$0xff]   ;;  %v43_v12 = vld [vmem:[%s576_s2 + $0x20] sm:$0xff] }
   0x7   :  { %49 = vperm.xlu0 %410, %v39_v7   ;;  %59 = vperm.xlu1 %411, %v41_v8  }
   0x8   :  { %388 = vmatmul.mubr.msk.bf16.vlgmr.msra.gmra.mrb[0].mxu0 %vm107_vm1, %v413_v4 }
   0x9   :  { %391 = vmatprep.mubr.msk.bf16.mxu0 %vm107_vm1, %v414_v5 }
   0xb   :  { %54 = vperm.xlu0 %410, %v40_v9   ;;  %64 = vperm.xlu1 %411, %v42_v10  }
   0xc   :  { %14 = vsyncpa [#allocation4], 0  ;;  %v45_v14 = vld [vmem:[%s576_s2 + $0x30] sm:$0xff]  ;;  %v46_v15 = vld [vmem:[%s576_s2 + $0x38] sm:$0xff]  ;;  %vm239_vm2 = vcmask 523264  }
   0xd   :  { %v205_v16 = vld [vmem:[%s578_s4] sm:$0xff]  ;;  %v206_v17 = vld [vmem:[%s578_s4 + $0x8] sm:$0xff]  ;;  %v207_v18 = vld [vmem:[%s578_s4 + $0x10] sm:$0xff] }
   0xe   :  { %v208_v19 = vld [vmem:[%s578_s4 + $0x18] sm:$0xff]  ;;  %v299_v20 = vld [vmem:[%s579_s5] sm:$0xff]  ;;  %v300_v21 = vld [vmem:[%s579_s5 + $0x8] sm:$0xff] }
   0xf   :  { %69 = vperm.xlu0 %410, %v43_v12   ;;  %74 = vperm.xlu1 %411, %v44_v13   ;;  %v301_v22 = vld [vmem:[%s579_s5 + $0x10] sm:$0xff]  ;;  %v302_v23 = vld [vmem:[%s579_s5 + $0x18] sm:$0xff]  ;;  %v336_v24 = vld [vmem:[#allocation2] sm:$0x1] }
  0x10   :  { %392 = vmatmul.mubr.msk.bf16.gmra.mrb[4].mxu0 %vm107_vm1, %v415_v11  ;;  %v416_v25 = vld [vmem:[%s577_s3] sm:$0xff]   ;;  %v417_v62 = vld [vmem:[%s577_s3 + $0x8] sm:$0xff]   ;;  %s443_s3 = smov [#allocation3]  }
  0x11   :  { %403 = vmatprep.mubr.msk.bf16.mxu1 %vm239_vm2, %v416_v25  ;;  %v342_v25 = vlaneseq  ;;  %s354_s18 = sshll.u32 %s443_s3, 4  ;;  %s355_s18 = int_to_ptr.vmem [resolvable:$true] %s354_s18 }
  0x12   :  { %s418_s19 = scalar_lea.vmem %s355_s18, 16  ;;  %s422_s20 = scalar_lea.vmem %s355_s18, 32 }
  0x13   :  { %79 = vperm.xlu0 %410, %v45_v14   ;;  %84 = vperm.xlu1 %411, %v46_v15   ;;  %p419_p0 = scmp.ne.s32.totalorder %s355_s18, %s418_s19  ;;  %p423_p1 = scmp.lt.s32.totalorder %s355_s18, %s355_s18 }
  0x14   :  { %p424_p2 = scmp.lt.s32.totalorder %s422_s20, %s418_s19 }
  0x16   :  { %p425_p3 = por %p424_p2, %p423_p1 }
  0x17   :  { %211 = vperm.xlu0 %410, %v205_v16   ;;  %216 = vperm.xlu1 %411, %v206_v17  }
  0x18   :  { %p426_p4 = pnand %p425_p3, %p419_p0 }
  0x1b   :  { %221 = vperm.xlu0 %410, %v207_v18   ;;  %226 = vperm.xlu1 %411, %v208_v19  }
  0x1f   :  { %305 = vperm.xlu0 %410, %v299_v20   ;;  %310 = vperm.xlu1 %411, %v300_v21  }
  0x23   :  { %315 = vperm.xlu0 %410, %v301_v22   ;;  %320 = vperm.xlu1 %411, %v302_v23  }
  0x27   :  { %339 = vperm.xlu0 %410, %v336_v24  }
  0x86   :  { %v50_v26 = vpop.permute.xlu0 %49  ;;  %v60_v27 = vpop.permute.xlu1 %59 }
  0x8a   :  { %v55_v28 = vpop.permute.xlu0 %54  ;;  %v65_v29 = vpop.permute.xlu1 %64 }
  0x8e   :  { %v70_v33 = vpop.permute.xlu0 %69  ;;  %v75_v38 = vpop.permute.xlu1 %74 }
  0x92   :  { %v80_v45 = vpop.permute.xlu0 %79  ;;  %v85_v50 = vpop.permute.xlu1 %84 }
  0x96   :  { %v212_v63 = vpop.permute.xlu0 %211  ;;  %v217_v0 = vpop.permute.xlu1 %216 }
  0x9a   :  { %v222_v1 = vpop.permute.xlu0 %221  ;;  %v227_v2 = vpop.permute.xlu1 %226 }
  0x9e   :  { %v306_v8 = vpop.permute.xlu0 %305  ;;  %v311_v13 = vpop.permute.xlu1 %310 }
  0xa2   :  { %v316_v19 = vpop.permute.xlu0 %315  ;;  %v321_v22 = vpop.permute.xlu1 %320 }
  0xdb   :  { %v389_v30 = vpop.f32.mrb[0].mxu0 }
  0xdc   :  { %v167_v31 = vadd.f32 %v389_v30, %v60_v27  ;;  %v158_v32 = vpop.f32.mrb[1].mxu0 }
  0xdd   :  { %v159_v34 = vadd.f32 %v158_v32, %v50_v26  ;;  %v390_v35 = vpop.f32.mrb[2].mxu0 }
  0xde   :  { %v170_v36 = vadd.f32 %v390_v35, %v65_v29  ;;  %v161_v37 = vpop.f32.mrb[3].mxu0  ;;  %v191_v40 = vmax.f32 %v167_v31, 0.0 }
  0xdf   :  { %v162_v39 = vadd.f32 %v161_v37, %v55_v28  ;;  %v189_v42 = vmax.f32 %v159_v34, 0.0  ;;  %v343_v28 = vshrl.u32 %v342_v25, 7 }
  0xe0   :  { %v192_v41 = vmax.f32 %v170_v36, 0.0 }
  0xe1   :  { %v190_v43 = vmax.f32 %v162_v39, 0.0  ;;  %v344_v31 = vsub.s32 0, %v343_v28 }
  0xe2   :  { %v202_v44 = vpack.c.bf16 %v192_v41, %v191_v40 }
  0xe3   :  { %v393_v46 = vpop.f32.mrb[4].mxu0  ;;  %v201_v47 = vpack.c.bf16 %v190_v43, %v189_v42 }
  0xe4   :  { %v183_v48 = vadd.f32 %v393_v46, %v80_v45  ;;  %v174_v49 = vpop.f32.mrb[5].mxu0 }
  0xe5   :  { %v175_v51 = vadd.f32 %v174_v49, %v70_v33  ;;  %v394_v52 = vpop.f32.mrb[6].mxu0  ;;  %395 = vmatprep.subr.bf16.mxu1 %v201_v47  ;;  %v340_v33 = vpop.permute.xlu0 %339 }
  0xe6   :  { %v186_v53 = vadd.f32 %v394_v52, %v85_v50  ;;  %v177_v54 = vpop.f32.mrb[7].mxu0  ;;  %396 = vmatpush3.bf16.msra.mxu1 %v201_v47  ;;  %v195_v56 = vmax.f32 %v183_v48, 0.0  ;;  %v345_v35 = vrot.slane %v340_v33, %v344_v31 }
  0xe7   :  { %v178_v55 = vadd.f32 %v177_v54, %v75_v38  ;;  %397 = vmatprep.subr.bf16.mxu1 %v202_v44  ;;  %v193_v58 = vmax.f32 %v175_v51, 0.0 }
  0xe8   :  { %v196_v57 = vmax.f32 %v186_v53, 0.0 }
  0xe9   :  { %v194_v59 = vmax.f32 %v178_v55, 0.0 }
  0xea   :  { %v204_v60 = vpack.c.bf16 %v196_v57, %v195_v56  ;;  %398 = vmatpush3.bf16.msra.mxu1 %v202_v44 }
  0xeb   :  { %v203_v61 = vpack.c.bf16 %v194_v59, %v193_v58 }
  0xed   :  { %399 = vmatprep.subr.bf16.mxu1 %v203_v61 }
  0xee   :  { %400 = vmatpush3.bf16.msra.mxu1 %v203_v61 }
  0xef   :  { %401 = vmatprep.subr.bf16.mxu1 %v204_v60 }
  0xf2   :  { %402 = vmatpush3.bf16.msra.mxu1 %v204_v60 }
  0xf5   :  { %404 = vmatmul.mubr.msk.bf16.vlgmr.msra.gmra.mrb[0].mxu1 %vm239_vm2, %v417_v62 }
 0x1c8   :  { %v405_v3 = vpop.f32.mrb[0].mxu1 }
 0x1c9   :  { %v280_v4 = vpop.f32.mrb[1].mxu1  ;;  %v289_v5 = vadd.f32 %v405_v3, %v222_v1 }
 0x1ca   :  { %v281_v6 = vadd.f32 %v280_v4, %v212_v63  ;;  %v406_v7 = vpop.f32.mrb[2].mxu1 }
 0x1cb   :  { %v283_v9 = vpop.f32.mrb[3].mxu1  ;;  %v292_v11 = vadd.f32 %v406_v7, %v227_v2  ;;  %v297_v14 = vmax.f32 %v289_v5, 0.0 }
 0x1cc   :  { %v295_v10 = vmax.f32 %v281_v6, 0.0  ;;  %v284_v12 = vadd.f32 %v283_v9, %v217_v0 }
 0x1cd   :  { %v298_v17 = vmax.f32 %v292_v11, 0.0  ;;  %v325_v20 = vmul.f32 %v316_v19, %v297_v14 }
 0x1ce   :  { %v296_v15 = vmax.f32 %v284_v12, 0.0  ;;  %v323_v16 = vmul.f32 %v306_v8, %v295_v10 }
 0x1cf   :  { %v326_v23 = vmul.f32 %v321_v22, %v298_v17 }
 0x1d0   :  { %v324_v18 = vmul.f32 %v311_v13, %v296_v15 }
 0x1d2   :  { %v327_v21 = vadd.f32 %v324_v18, %v323_v16 }
 0x1d4   :  { %v328_v24 = vadd.f32 %v327_v21, %v325_v20 }
 0x1d6   :  { %v329_v26 = vadd.f32 %v328_v24, %v326_v23 }
 0x1d8   :  { %v330_v27 = vrot.slane %v329_v26, 4 }
 0x1da   :  { %v331_v29 = vadd.f32 %v330_v27, %v329_v26 }
 0x1dc   :  { %v332_v30 = vrot.slane %v331_v29, 2 }
 0x1de   :  { %v333_v32 = vadd.f32 %v332_v30, %v331_v29 }
 0x1e0   :  { %v334_v34 = vrot.slane %v333_v32, 1 }
 0x1e2   :  { %v335_v36 = vadd.f32 %v334_v34, %v333_v32 }
 0x1e4   :  { %v346_v37 = vadd.f32 %v345_v35, %v335_v36 }
 0x1e6   :  { %347 = vst [vmem:[#allocation3] sm:$0x1] %v346_v37 }
 0x1e7   :  { %429 = shalt.err (!%p426_p4)
}
 0x1e8   :  { %s430_s23 = scalar_lea.hbm %s581_s7, 16 }
 0x1e9   :  { %p431_p5 = scmp.ne.s32.totalorder %s581_s7, %s430_s23  ;;  %p434_p6 = scmp.lt.u32.totalorder %s430_s23, %s581_s7 }
 0x1eb   :  { %p436_p7 = pnand %p434_p6, %p431_p5 }
 0x1ed   :  { %439 = shalt.err (!%p436_p7)
}
 0x1ee   :  { %357 = dma.vmem_to_hbm [thread:$0]  %s355_s18, 16, %s581_s7, [#allocation4]  }
 0x1ef   :  { %440 = dma.done.wait [#allocation4], 16  }
 0x1f0   :  { %441 = vsyncadd [#allocation4], 4294967280 }
 0x1f1   :  { %361 = vsyncpa [#allocation4], 1 }

</bundles_post_ra>
